<compile_context>
chip_gen: v6e
topology: v6e:2x2x1
jax: 0.10.0
libtpu: 0.0.40
codegen_flags: <defaults>
</compile_context>

<pallas_src>
import functools
import math

import jax
import jax.numpy as jnp
from jax.experimental import pallas as pl
from jax.experimental.pallas import tpu as pltpu


# ----------------------------------------------------------------------------
# helpers
# ----------------------------------------------------------------------------
def _gelu(x):
    c = math.sqrt(2.0 / math.pi)
    return 0.5 * x * (1.0 + jnp.tanh(c * (x + 0.044715 * x * x * x)))


def _pick_tile(dim, candidates):
    for c in candidates:
        if dim >= c and dim % c == 0:
            return c
    return dim


def _wspec(shape, index_map, steps):
    # deeper weight-stream pipelining only when the reduction axis actually has steps
    if steps >= 3:
        return pl.BlockSpec(shape, index_map, pipeline_mode=pl.Buffered(3))
    return pl.BlockSpec(shape, index_map)


def _ln_rows(y, g, b, eps):
    mean = jnp.mean(y, axis=-1, keepdims=True)
    yc = y - mean
    var = jnp.mean(yc * yc, axis=-1, keepdims=True)
    return yc * jax.lax.rsqrt(var + eps) * g + b


# ----------------------------------------------------------------------------
# tiled fused linear: out = act(x @ w + b), bf16 in/out, f32 accumulate
# ----------------------------------------------------------------------------
def _linear_kernel(x_ref, w_ref, b_ref, o_ref, acc_ref, *, activation):
    k = pl.program_id(2)

    @pl.when(k == 0)
    def _():
        acc_ref[...] = jnp.zeros_like(acc_ref)

    acc_ref[...] += jnp.dot(
        x_ref[...].astype(jnp.bfloat16),
        w_ref[...].astype(jnp.bfloat16),
        preferred_element_type=jnp.float32,
    )

    @pl.when(k == pl.num_programs(2) - 1)
    def _():
        acc = acc_ref[...] + b_ref[...]
        if activation == "gelu":
            acc = _gelu(acc)
        elif activation == "tanh":
            acc = jnp.tanh(acc)
        o_ref[...] = acc.astype(o_ref.dtype)


def linear(x, w, b, activation="none", out_dtype=jnp.bfloat16):
    M, K = x.shape
    N = w.shape[1]
    tm = _pick_tile(M, (256, 128, 64, 32, 16, 8))
    tn = _pick_tile(N, (2304, 1536, 1152, 768, 512, 384, 256, 128))
    tk = _pick_tile(K, (1024, 768, 512, 256))
    grid = (M // tm, N // tn, K // tk)
    return pl.pallas_call(
        functools.partial(_linear_kernel, activation=activation),
        out_shape=jax.ShapeDtypeStruct((M, N), out_dtype),
        grid_spec=pltpu.PrefetchScalarGridSpec(
            num_scalar_prefetch=0,
            grid=grid,
            in_specs=[
                pl.BlockSpec((tm, tk), lambda i, j, k: (i, k)),
                _wspec((tk, tn), lambda i, j, k: (k, j), grid[2]),
                pl.BlockSpec((1, tn), lambda i, j, k: (0, j)),
            ],
            out_specs=pl.BlockSpec((tm, tn), lambda i, j, k: (i, j)),
            scratch_shapes=[pltpu.VMEM((tm, tn), jnp.float32)],
        ),
        compiler_params=pltpu.CompilerParams(
            dimension_semantics=("parallel", "parallel", "arbitrary")),
    )(x, w, b.reshape(1, N))


# ----------------------------------------------------------------------------
# fused linear + residual + layernorm: LN(x@w + b + resid)    (tn == N)
# ----------------------------------------------------------------------------
def _linear_res_ln_kernel(x_ref, w_ref, b_ref, r_ref, g_ref, bb_ref, o_ref,
                          acc_ref, *, eps):
    k = pl.program_id(1)

    @pl.when(k == 0)
    def _():
        acc_ref[...] = jnp.zeros_like(acc_ref)

    acc_ref[...] += jnp.dot(
        x_ref[...].astype(jnp.bfloat16),
        w_ref[...].astype(jnp.bfloat16),
        preferred_element_type=jnp.float32,
    )

    @pl.when(k == pl.num_programs(1) - 1)
    def _():
        y = acc_ref[...] + b_ref[...] + r_ref[...].astype(jnp.float32)
        o_ref[...] = _ln_rows(y, g_ref[...], bb_ref[...], eps).astype(o_ref.dtype)


def linear_res_ln(x, w, b, resid, g, beta, eps=1e-12):
    M, K = x.shape
    N = w.shape[1]
    tm = _pick_tile(M, (256, 128, 64, 32, 16, 8))
    tk = _pick_tile(K, (1024, 768, 512, 256))
    grid = (M // tm, K // tk)
    return pl.pallas_call(
        functools.partial(_linear_res_ln_kernel, eps=eps),
        out_shape=jax.ShapeDtypeStruct((M, N), jnp.bfloat16),
        grid_spec=pltpu.PrefetchScalarGridSpec(
            num_scalar_prefetch=0,
            grid=grid,
            in_specs=[
                pl.BlockSpec((tm, tk), lambda i, k: (i, k)),
                _wspec((tk, N), lambda i, k: (k, 0), grid[1]),
                pl.BlockSpec((1, N), lambda i, k: (0, 0)),
                pl.BlockSpec((tm, N), lambda i, k: (i, 0)),
                pl.BlockSpec((1, N), lambda i, k: (0, 0)),
                pl.BlockSpec((1, N), lambda i, k: (0, 0)),
            ],
            out_specs=pl.BlockSpec((tm, N), lambda i, k: (i, 0)),
            scratch_shapes=[pltpu.VMEM((tm, N), jnp.float32)],
        ),
        compiler_params=pltpu.CompilerParams(
            dimension_semantics=("parallel", "arbitrary")),
    )(x, w, b.reshape(1, N), resid, g.reshape(1, N), beta.reshape(1, N))


# ----------------------------------------------------------------------------
# plain layernorm (embeddings), bf16 out
# ----------------------------------------------------------------------------
def _ln_kernel(x_ref, g_ref, b_ref, o_ref, *, eps):
    y = _ln_rows(x_ref[...].astype(jnp.float32), g_ref[...], b_ref[...], eps)
    o_ref[...] = y.astype(o_ref.dtype)


def layernorm(x, g, b, eps=1e-12):
    M, H = x.shape
    tm = _pick_tile(M, (512, 256, 128, 64, 32, 16, 8))
    return pl.pallas_call(
        functools.partial(_ln_kernel, eps=eps),
        out_shape=jax.ShapeDtypeStruct((M, H), jnp.bfloat16),
        grid=(M // tm,),
        in_specs=[
            pl.BlockSpec((tm, H), lambda i: (i, 0)),
            pl.BlockSpec((1, H), lambda i: (0, 0)),
            pl.BlockSpec((1, H), lambda i: (0, 0)),
        ],
        out_specs=pl.BlockSpec((tm, H), lambda i: (i, 0)),
        compiler_params=pltpu.CompilerParams(dimension_semantics=("parallel",)),
    )(x, g.reshape(1, H), b.reshape(1, H))


# ----------------------------------------------------------------------------
# attention: grid over (batch, head-group); q/k/v sliced from the fused QKV
# tensor by BlockSpec (128-lane aligned), lane-dense (S, 2*dh) output store.
# ----------------------------------------------------------------------------
def _attn_kernel(q_ref, k_ref, v_ref, o_ref, *, dh, hpb, scale):
    outs = []
    for h in range(hpb):
        q = q_ref[0, :, h * dh:(h + 1) * dh]
        k = k_ref[0, :, h * dh:(h + 1) * dh]
        v = v_ref[0, :, h * dh:(h + 1) * dh]
        s = jax.lax.dot_general(q, k, (((1,), (1,)), ((), ())),
                                preferred_element_type=jnp.float32) * scale
        s = s - jnp.max(s, axis=-1, keepdims=True)
        p = jnp.exp(s)
        p = p * pl.reciprocal(jnp.sum(p, axis=-1, keepdims=True), approx=True)
        outs.append(jnp.dot(p.astype(jnp.bfloat16), v,
                            preferred_element_type=jnp.float32))
    o_ref[0, :, :] = jnp.concatenate(outs, axis=-1).astype(o_ref.dtype)


def attention(qkv, nh, dh):
    # qkv: (B, S, 3H) bf16; full attention, no mask; dropout = eval identity
    B, S, H3 = qkv.shape
    H = H3 // 3
    hpb = max(1, 128 // dh)           # heads per block -> 128-lane aligned slices
    while hpb > 1 and nh % hpb != 0:
        hpb //= 2
    bw = hpb * dh
    nhb = nh // hpb                    # head-groups
    scale = 1.0 / math.sqrt(dh)
    return pl.pallas_call(
        functools.partial(_attn_kernel, dh=dh, hpb=hpb, scale=scale),
        out_shape=jax.ShapeDtypeStruct((B, S, H), jnp.bfloat16),
        grid=(B, nhb),
        in_specs=[
            pl.BlockSpec((1, S, bw), lambda b, g: (b, 0, g)),
            pl.BlockSpec((1, S, bw), lambda b, g: (b, 0, nhb + g)),
            pl.BlockSpec((1, S, bw), lambda b, g: (b, 0, 2 * nhb + g)),
        ],
        out_specs=pl.BlockSpec((1, S, bw), lambda b, g: (b, 0, g)),
        compiler_params=pltpu.CompilerParams(
            dimension_semantics=("parallel", "parallel")),
    )(qkv, qkv, qkv)


# ----------------------------------------------------------------------------
# fused FFN + residual + LN: LN(gelu(x@W1+b1)@W2 + b2 + resid), intermediate in VMEM
# ----------------------------------------------------------------------------
def _ffn_res_ln_kernel(x_ref, w1_ref, b1_ref, w2_ref, b2_ref, r_ref, g_ref, bb_ref,
                       o_ref, acc_ref, *, eps):
    j = pl.program_id(1)

    @pl.when(j == 0)
    def _():
        acc_ref[...] = jnp.zeros_like(acc_ref)

    x = x_ref[...].astype(jnp.bfloat16)
    h = jnp.dot(x, w1_ref[...], preferred_element_type=jnp.float32) + b1_ref[...]
    h = _gelu(h)
    acc_ref[...] += jnp.dot(h.astype(jnp.bfloat16), w2_ref[...],
                            preferred_element_type=jnp.float32)

    @pl.when(j == pl.num_programs(1) - 1)
    def _():
        y = acc_ref[...] + b2_ref[...] + r_ref[...].astype(jnp.float32)
        o_ref[...] = _ln_rows(y, g_ref[...], bb_ref[...], eps).astype(o_ref.dtype)


def ffn_res_ln(x, w1, b1, w2, b2, resid, g, beta, eps=1e-12):
    M, H = x.shape
    I = w1.shape[1]
    tm = _pick_tile(M, (256, 128, 64, 32, 16, 8))
    ti = _pick_tile(I, (1024, 768, 512, 256))
    grid = (M // tm, I // ti)
    return pl.pallas_call(
        functools.partial(_ffn_res_ln_kernel, eps=eps),
        out_shape=jax.ShapeDtypeStruct((M, H), jnp.bfloat16),
        grid_spec=pltpu.PrefetchScalarGridSpec(
            num_scalar_prefetch=0,
            grid=grid,
            in_specs=[
                pl.BlockSpec((tm, H), lambda i, j: (i, 0)),
                _wspec((H, ti), lambda i, j: (0, j), grid[1]),
                pl.BlockSpec((1, ti), lambda i, j: (0, j)),
                _wspec((ti, H), lambda i, j: (j, 0), grid[1]),
                pl.BlockSpec((1, H), lambda i, j: (0, 0)),
                pl.BlockSpec((tm, H), lambda i, j: (i, 0)),
                pl.BlockSpec((1, H), lambda i, j: (0, 0)),
                pl.BlockSpec((1, H), lambda i, j: (0, 0)),
            ],
            out_specs=pl.BlockSpec((tm, H), lambda i, j: (i, 0)),
            scratch_shapes=[pltpu.VMEM((tm, H), jnp.float32)],
        ),
        compiler_params=pltpu.CompilerParams(
            dimension_semantics=("parallel", "arbitrary")),
    )(x, w1, b1.reshape(1, I), w2, b2.reshape(1, H),
      resid, g.reshape(1, H), beta.reshape(1, H))


# ----------------------------------------------------------------------------
# fused MoE FFN + down-projection + residual + LN:
#   LN( gelu(shared(x) + sum_e gate_e*expert_e(x)) @ o_w + o_b + resid )
# The (M, I) intermediate and the (E, M, I) expert tensor never touch HBM.
# ----------------------------------------------------------------------------
def _moe_res_ln_kernel(x_ref, gate_ref, ws_ref, bs_ref, we_ref, be_ref,
                       ow_ref, ob_ref, r_ref, g_ref, bb_ref, o_ref, acc_ref,
                       *, num_experts, eps):
    j = pl.program_id(1)

    @pl.when(j == 0)
    def _():
        acc_ref[...] = jnp.zeros_like(acc_ref)

    x = x_ref[...].astype(jnp.bfloat16)
    h = jnp.dot(x, ws_ref[...], preferred_element_type=jnp.float32) + bs_ref[...]
    for e in range(num_experts):
        eo = jnp.dot(x, we_ref[e], preferred_element_type=jnp.float32) + be_ref[e]
        h = h + gate_ref[:, e:e + 1] * eo
    h = _gelu(h)
    acc_ref[...] += jnp.dot(h.astype(jnp.bfloat16), ow_ref[...],
                            preferred_element_type=jnp.float32)

    @pl.when(j == pl.num_programs(1) - 1)
    def _():
        y = acc_ref[...] + ob_ref[...] + r_ref[...].astype(jnp.float32)
        o_ref[...] = _ln_rows(y, g_ref[...], bb_ref[...], eps).astype(o_ref.dtype)


def moe_ffn_res_ln(x, gate, shared_w, shared_b, expert_w, expert_b,
                   o_w, o_b, resid, g, beta, eps=1e-12):
    M, H = x.shape
    E, _, I = expert_w.shape
    tm = _pick_tile(M, (256, 128, 64, 32, 16, 8))
    ti = _pick_tile(I, (768, 512, 256, 128))   # keep modest: (E,H,ti) slab * 2 buffers
    grid = (M // tm, I // ti)
    return pl.pallas_call(
        functools.partial(_moe_res_ln_kernel, num_experts=E, eps=eps),
        out_shape=jax.ShapeDtypeStruct((M, H), jnp.bfloat16),
        grid_spec=pltpu.PrefetchScalarGridSpec(
            num_scalar_prefetch=0,
            grid=grid,
            in_specs=[
                pl.BlockSpec((tm, H), lambda i, j: (i, 0)),
                pl.BlockSpec((tm, E), lambda i, j: (i, 0)),
                pl.BlockSpec((H, ti), lambda i, j: (0, j)),
                pl.BlockSpec((1, ti), lambda i, j: (0, j)),
                pl.BlockSpec((E, H, ti), lambda i, j: (0, 0, j)),
                pl.BlockSpec((E, 1, ti), lambda i, j: (0, 0, j)),
                pl.BlockSpec((ti, H), lambda i, j: (j, 0)),
                pl.BlockSpec((1, H), lambda i, j: (0, 0)),
                pl.BlockSpec((tm, H), lambda i, j: (i, 0)),
                pl.BlockSpec((1, H), lambda i, j: (0, 0)),
                pl.BlockSpec((1, H), lambda i, j: (0, 0)),
            ],
            out_specs=pl.BlockSpec((tm, H), lambda i, j: (i, 0)),
            scratch_shapes=[pltpu.VMEM((tm, H), jnp.float32)],
        ),
        compiler_params=pltpu.CompilerParams(
            dimension_semantics=("parallel", "arbitrary")),
    )(x, gate, shared_w, shared_b.reshape(1, I), expert_w, expert_b,
      o_w, o_b.reshape(1, H), resid, g.reshape(1, H), beta.reshape(1, H))


# ----------------------------------------------------------------------------
# parameter init (deterministic, synthetic; weights stored bf16 for the MXU)
# ----------------------------------------------------------------------------
def init_params(key, cfg):
    H, I, E = cfg["hidden"], cfg["intermediate"], cfg["num_experts"]
    CLIP = cfg["clip_dim"]
    kit = iter(jax.random.split(key, 256))

    def rnd(shape, scale=0.02, dtype=jnp.bfloat16):
        return (jax.random.normal(next(kit), shape, jnp.float32) * scale).astype(dtype)

    def dense(fi, fo):
        return {"w": rnd((fi, fo)), "b": jnp.zeros((fo,), jnp.float32)}

    params = {
        # TODO(synk): CLIPAligner internals unspecified; modeled as a single Linear(512->768).
        "img_aligner": dense(CLIP, H),
        "speech_aligner": dense(CLIP, H),
        "embeddings": {
            "word": rnd((cfg["vocab"], H), dtype=jnp.float32),
            "pos": rnd((cfg["max_pos"], H), dtype=jnp.float32),
            "type": rnd((cfg["type_vocab"], H), dtype=jnp.float32),
            "ln_g": jnp.ones((H,), jnp.float32),
            "ln_b": jnp.zeros((H,), jnp.float32),
        },
        "pooler": dense(H, H),
        "classifier": dense(H, cfg["num_labels"]),
    }

    layers = []
    for li in range(cfg["num_layers"]):
        lp = {
            "wqkv": rnd((H, 3 * H)),                     # fused Q/K/V projection
            "bqkv": jnp.zeros((3 * H,), jnp.float32),
            "ao_w": rnd((H, H)), "ao_b": jnp.zeros((H,), jnp.float32),
            "ao_ln_g": jnp.ones((H,), jnp.float32), "ao_ln_b": jnp.zeros((H,), jnp.float32),
            "o_w": rnd((I, H)), "o_b": jnp.zeros((H,), jnp.float32),
            "o_ln_g": jnp.ones((H,), jnp.float32), "o_ln_b": jnp.zeros((H,), jnp.float32),
            "is_moe": li in cfg["moe_position"],
        }
        if lp["is_moe"]:
            # TODO(synk): SharedExpertMOE internals unspecified; modeled as router +
            #             top-k weighted experts + always-on shared expert.
            lp["moe"] = {
                "router_w": rnd((H, E), dtype=jnp.float32),
                "router_b": jnp.zeros((E,), jnp.float32),
                "shared_w": rnd((H, I)), "shared_b": jnp.zeros((I,), jnp.float32),
                "expert_w": rnd((E, H, I)),
                "expert_b": jnp.zeros((E, 1, I), jnp.float32),
            }
        else:
            lp["i_w"] = rnd((H, I))
            lp["i_b"] = jnp.zeros((I,), jnp.float32)
        layers.append(lp)
    params["layers"] = layers
    return params


# ----------------------------------------------------------------------------
# forward pass (MMBert.forward)
# ----------------------------------------------------------------------------
def mmbert_forward(params, text_ids, speech_embd, img_embd, cfg):
    H = cfg["hidden"]
    nh = cfg["heads"]
    dh = H // nh

    def aligner(p, xin):
        Bx, Sx, F = xin.shape
        return linear(xin.reshape(Bx * Sx, F), p["w"], p["b"]).reshape(Bx, Sx, H)

    img_aligned = aligner(params["img_aligner"], img_embd)            # bf16
    speech_aligned = aligner(params["speech_aligner"], speech_embd)   # bf16

    # BERT embeddings on the text ids (dropout is identity at inference)
    B, T = text_ids.shape
    emb = params["embeddings"]
    word = jnp.take(emb["word"], text_ids, axis=0)                    # (B, T, H)
    pos = emb["pos"][:T][None, :, :]                                  # (1, T, H)
    tok = emb["type"][0][None, None, :]                               # (1, 1, H)
    text_embd = word + pos + tok
    text_embd = layernorm(text_embd.reshape(B * T, H),
                          emb["ln_g"], emb["ln_b"]).reshape(B, T, H)  # bf16

    # concatenate along the sequence axis (dim=1)
    x = jnp.concatenate([text_embd, speech_aligned, img_aligned], axis=1)
    B, S, H = x.shape
    M = B * S

    for lp in params["layers"]:
        xf = x.reshape(M, H)                                          # bf16

        # fused QKV projection; attention slices head-pairs via BlockSpec
        qkv = linear(xf, lp["wqkv"], lp["bqkv"])                      # (M, 3H) bf16
        ctx = attention(qkv.reshape(B, S, 3 * H), nh, dh)             # (B, S, H) bf16

        # attention output projection + residual + LN fused in one kernel
        x1 = linear_res_ln(ctx.reshape(M, H), lp["ao_w"], lp["ao_b"], xf,
                           lp["ao_ln_g"], lp["ao_ln_b"])              # (M, H) bf16

        if lp["is_moe"]:
            mp = lp["moe"]
            # router (N = num_experts, lane-sparse) kept in plain XLA
            router_logits = (jnp.dot(x1.astype(jnp.float32), mp["router_w"])
                             + mp["router_b"])                        # (M, E) f32
            probs = jax.nn.softmax(router_logits, axis=-1)
            topw, topi = jax.lax.top_k(probs, cfg["top_k"])
            topw = topw / jnp.sum(topw, axis=-1, keepdims=True)
            rows = jnp.arange(probs.shape[0])[:, None]
            gate = jnp.zeros_like(probs).at[rows, topi].set(topw)     # (M, E)

            x2 = moe_ffn_res_ln(x1, gate, mp["shared_w"], mp["shared_b"],
                                mp["expert_w"], mp["expert_b"],
                                lp["o_w"], lp["o_b"], x1,
                                lp["o_ln_g"], lp["o_ln_b"])           # (M, H) bf16
        else:
            x2 = ffn_res_ln(x1, lp["i_w"], lp["i_b"], lp["o_w"], lp["o_b"],
                            x1, lp["o_ln_g"], lp["o_ln_b"])           # (M, H) bf16

        x = x2.reshape(B, S, H)

    # pooler (M=B rows) and classifier (N=2) are tiny lane-sparse matmuls -> plain XLA
    cls = x[:, 0, :].astype(jnp.float32)
    pooled = jnp.tanh(cls @ params["pooler"]["w"].astype(jnp.float32)
                      + params["pooler"]["b"])
    logits = (pooled @ params["classifier"]["w"].astype(jnp.float32)
              + params["classifier"]["b"])
    return logits


# ----------------------------------------------------------------------------
# main
# ----------------------------------------------------------------------------
if __name__ == "__main__":
    cfg = dict(
        hidden=768, intermediate=3072, heads=12, num_layers=2,
        moe_position=(1,), num_experts=4, top_k=2,
        clip_dim=512, vocab=100, max_pos=64, type_vocab=2, num_labels=2,
    )

    key = jax.random.PRNGKey(0)
    kp, kt, ks, ki = jax.random.split(key, 4)
    params = init_params(kp, cfg)

    B, T, S_speech, S_img = 2, 8, 4, 4
    text_ids = jax.random.randint(kt, (B, T), 0, cfg["vocab"], dtype=jnp.int32)
    speech_embd = jax.random.normal(ks, (B, S_speech, cfg["clip_dim"]), jnp.float32)
    img_embd = jax.random.normal(ki, (B, S_img, cfg["clip_dim"]), jnp.float32)

    logits = mmbert_forward(params, text_ids, speech_embd, img_embd, cfg)
    logits = jax.block_until_ready(logits)
    assert logits.shape == (B, cfg["num_labels"]) and logits.dtype == jnp.float32
    print("KERNEL_OK")
</pallas_src>

<mosaic_0001>
module attributes {stable_mosaic.version = 11 : i64} {
  func.func @_linear_kernel(%arg0: i32, %arg1: i32, %arg2: i32, %arg3: memref<8x512xf32, #tpu.memory_space<vmem>>, %arg4: memref<512x768xbf16, #tpu.memory_space<vmem>>, %arg5: memref<1x768xf32, #tpu.memory_space<vmem>>, %arg6: memref<8x768xbf16, #tpu.memory_space<vmem>>, %arg7: memref<8x768xf32, #tpu.memory_space<vmem>>) attributes {dimension_semantics = [#tpu.dimension_semantics<parallel>, #tpu.dimension_semantics<parallel>, #tpu.dimension_semantics<arbitrary>], iteration_bounds = array<i64: 1, 1, 1>, scalar_prefetch = 0 : i64, scratch_operands = 1 : i64, tpu.core_type = #tpu.core_type<tc>, window_params = [{transform_indices = @transform_0, window_bounds = array<i64: 8, 512>}, {transform_indices = @transform_1, window_bounds = array<i64: 512, 768>}, {transform_indices = @transform_2, window_bounds = array<i64: 1, 768>}, {transform_indices = @transform_3, window_bounds = array<i64: 8, 768>}]} {
    %c0_i32 = arith.constant 0 : i32
    %0 = arith.cmpi eq, %arg2, %c0_i32 : i32
    %1 = arith.extui %0 : i1 to i32
    %c0_i32_0 = arith.constant 0 : i32
    %2 = arith.cmpi ne, %1, %c0_i32_0 : i32
    scf.if %2 {
      %cst_10 = arith.constant 0.000000e+00 : f32
      %13 = vector.broadcast %cst_10 : f32 to vector<8x768xf32>
      %c0_11 = arith.constant 0 : index
      %c0_12 = arith.constant 0 : index
      %14 = vector.load %arg7[%c0_11, %c0_12] : memref<8x768xf32, #tpu.memory_space<vmem>>, vector<8x768xf32>
      tpu.vector_store %arg7[%c0_11, %c0_12], %13 {strides = array<i32>} : memref<8x768xf32, #tpu.memory_space<vmem>>, vector<8x768xf32>,
    } else {
    }
    %c0 = arith.constant 0 : index
    %c0_1 = arith.constant 0 : index
    %3 = vector.load %arg7[%c0, %c0_1] : memref<8x768xf32, #tpu.memory_space<vmem>>, vector<8x768xf32>
    %c0_2 = arith.constant 0 : index
    %c0_3 = arith.constant 0 : index
    %4 = vector.load %arg3[%c0_2, %c0_3] : memref<8x512xf32, #tpu.memory_space<vmem>>, vector<8x512xf32>
    %5 = arith.truncf %4 : vector<8x512xf32> to vector<8x512xbf16>
    %c0_4 = arith.constant 0 : index
    %c0_5 = arith.constant 0 : index
    %6 = vector.load %arg4[%c0_4, %c0_5] : memref<512x768xbf16, #tpu.memory_space<vmem>>, vector<512x768xbf16>
    %cst = arith.constant dense<0.000000e+00> : vector<8x768xf32>
    %7 = tpu.matmul %5, %6, %cst {dimension_numbers = #tpu.dot_dimension_numbers<[1], [0], [0], [1], [0, 0, 1, 1], [], []>} : vector<8x512xbf16>, vector<512x768xbf16>, vector<8x768xf32> -> vector<8x768xf32>
    %8 = arith.addf %3, %7 : vector<8x768xf32>
    %c0_6 = arith.constant 0 : index
    %c0_7 = arith.constant 0 : index
    %9 = vector.load %arg7[%c0_6, %c0_7] : memref<8x768xf32, #tpu.memory_space<vmem>>, vector<8x768xf32>
    tpu.vector_store %arg7[%c0_6, %c0_7], %8 {strides = array<i32>} : memref<8x768xf32, #tpu.memory_space<vmem>>, vector<8x768xf32>,
    %c0_i32_8 = arith.constant 0 : i32
    %10 = arith.cmpi eq, %arg2, %c0_i32_8 : i32
    %11 = arith.extui %10 : i1 to i32
    %c0_i32_9 = arith.constant 0 : i32
    %12 = arith.cmpi ne, %11, %c0_i32_9 : i32
    scf.if %12 {
      %c0_10 = arith.constant 0 : index
      %c0_11 = arith.constant 0 : index
      %13 = vector.load %arg7[%c0_10, %c0_11] : memref<8x768xf32, #tpu.memory_space<vmem>>, vector<8x768xf32>
      %c0_12 = arith.constant 0 : index
      %c0_13 = arith.constant 0 : index
      %14 = vector.load %arg5[%c0_12, %c0_13] : memref<1x768xf32, #tpu.memory_space<vmem>>, vector<1x768xf32>
      %15 = vector.broadcast %14 : vector<1x768xf32> to vector<8x768xf32>
      %16 = arith.addf %13, %15 : vector<8x768xf32>
      %17 = arith.truncf %16 : vector<8x768xf32> to vector<8x768xbf16>
      %c0_14 = arith.constant 0 : index
      %c0_15 = arith.constant 0 : index
      %18 = vector.load %arg6[%c0_14, %c0_15] : memref<8x768xbf16, #tpu.memory_space<vmem>>, vector<8x768xbf16>
      tpu.vector_store %arg6[%c0_14, %c0_15], %17 {strides = array<i32>} : memref<8x768xbf16, #tpu.memory_space<vmem>>, vector<8x768xbf16>,
    } else {
    }
    return
  }
  func.func @transform_0(%arg0: i32, %arg1: i32, %arg2: i32) -> (i32, i32) {
    %c0_i32 = arith.constant 0 : i32
    return %arg0, %arg2 : i32, i32
  }
  func.func @transform_1(%arg0: i32, %arg1: i32, %arg2: i32) -> (i32, i32) {
    %c0_i32 = arith.constant 0 : i32
    return %arg2, %arg1 : i32, i32
  }
  func.func @transform_2(%arg0: i32, %arg1: i32, %arg2: i32) -> (i32, i32) {
    %c0_i32 = arith.constant 0 : i32
    %c0_i32_0 = arith.constant 0 : i32
    return %c0_i32, %arg1 : i32, i32
  }
  func.func @transform_3(%arg0: i32, %arg1: i32, %arg2: i32) -> (i32, i32) {
    %c0_i32 = arith.constant 0 : i32
    return %arg0, %arg1 : i32, i32
  }
}

</mosaic_0001>

<bundles_post_ra>
// kernel: tpu_custom_call.1
= control target key start
LH: loop header
LB: loop body
LE: loop exit
PB: predicated region body
PF: predicated region fallthrough
CT: control target
= control target key end

     0   :  { %8 = vsyncpa [#allocation4], 0  ;;  %s2212_s0 = inlined_call_operand.hbm [shape: f32[8,512], index: 0, kind: input, shape index: {}]   ;;  %s2213_s1 = inlined_call_operand.hbm [shape: bf16[512,768], index: 1, kind: input, shape index: {}]   ;;  %s2214_s2 = inlined_call_operand.hbm [shape: f32[1,768], index: 2, kind: input, shape index: {}]   ;;  %s2215_s3 = inlined_call_operand.hbm [shape: bf16[8,768], index: 3, kind: output, shape index: {}]  }
   0x1   :  { %9 = vsyncpa [#allocation7], 0 }
   0x2   :  { %10 = vsyncpa [#allocation5], 0  ;;  %s2154_s12 = smov [#allocation6]  }
   0x3   :  { %s26_s13 = sshll.u32 %s2154_s12, 4  ;;  %s27_s13 = int_to_ptr.vmem [resolvable:$true] %s26_s13 }
   0x4   :  { %s2076_s14 = scalar_lea.vmem %s27_s13, 24576  ;;  %p2081_p1 = scmp.lt.s32.totalorder %s27_s13, %s27_s13 }
   0x5   :  { %p2077_p0 = scmp.ne.s32.totalorder %s27_s13, %s2076_s14  ;;  %p2082_p2 = scmp.lt.s32.totalorder %s2076_s14, %s2076_s14 }
   0x7   :  { %p2083_p3 = por %p2082_p2, %p2081_p1 }
   0x9   :  { %p2084_p4 = pnand %p2083_p3, %p2077_p0 }
   0xb   :  { %2087 = shalt.err (!%p2084_p4)
}
   0xc   :  { %s2155_s15 = smov 384   ;;  %s2156_s16 = smov 24  }
   0xd   :  { %32 = dma.hbm_to_vmem [thread:$0]  %s2213_s1, 24576, %s27_s13, [#allocation7], %s2155_s15, %s2155_s15, %s2156_s16  }
   0xe   :  { %s2157_s19 = smov [#allocation3]   ;;  %s2158_s21 = smov [#allocation8]  }
   0xf   :  { %s17_s20 = sshll.u32 %s2157_s19, 4  ;;  %s39_s22 = sshll.u32 %s2158_s21, 4  ;;  %s18_s20 = int_to_ptr.vmem [resolvable:$true] %s17_s20  ;;  %s40_s22 = int_to_ptr.vmem [resolvable:$true] %s39_s22 }
  0x10   :  { %s2096_s23 = scalar_lea.vmem %s18_s20, 512  ;;  %p2101_p6 = scmp.lt.s32.totalorder %s18_s20, %s18_s20 }
  0x11   :  { %p2097_p5 = scmp.ne.s32.totalorder %s18_s20, %s2096_s23  ;;  %p2102_p7 = scmp.lt.s32.totalorder %s2096_s23, %s2096_s23 }
  0x13   :  { %p2103_p8 = por %p2102_p7, %p2101_p6 }
  0x15   :  { %p2104_p9 = pnand %p2103_p8, %p2097_p5 }
  0x17   :  { %2107 = shalt.err (!%p2104_p9)
}
  0x18   :  { %20 = dma.hbm_to_vmem [thread:$0]  %s2212_s0, 512, %s18_s20, [#allocation4]  }
  0x19   :  { %s2116_s26 = scalar_lea.vmem %s40_s22, 96  ;;  %p2121_p11 = scmp.lt.s32.totalorder %s40_s22, %s40_s22 }
  0x1a   :  { %p2117_p10 = scmp.ne.s32.totalorder %s40_s22, %s2116_s26  ;;  %p2122_p12 = scmp.lt.s32.totalorder %s2116_s26, %s2116_s26 }
  0x1c   :  { %p2123_p13 = por %p2122_p12, %p2121_p11 }
  0x1e   :  { %p2124_p0 = pnand %p2123_p13, %p2117_p10 }
  0x20   :  { %2127 = shalt.err (!%p2124_p0)
}
  0x21   :  { %42 = dma.hbm_to_vmem [thread:$0]  %s2214_s2, 96, %s40_s22, [#allocation7]  }
  0x22   :  { %2148 = dma.done.wait [#allocation4], 512  }
  0x23   :  { %2149 = vsyncadd [#allocation4], 4294966784 }
  0x24   :  { %2150 = dma.done.wait [#allocation7], 24672  }
  0x25   :  { %2151 = vsyncadd [#allocation7], 4294942624  ;;  %v1780_v0 = vld [vmem:[#allocation6 + $0x154] ss:$24 sps:$4 sm:$0xff]   ;;  %v1784_v2 = vld [vmem:[#allocation6 + $0x150] ss:$24 sps:$4 sm:$0xff]  }
  0x26   :  { %v1782_v1 = vld [vmem:[#allocation6 + $0x454] ss:$24 sps:$4 sm:$0xff]   ;;  %1228 = vmatprep.subr.bf16.mxu0 %v1780_v0  ;;  %v1785_v3 = vld [vmem:[#allocation6 + $0x450] ss:$24 sps:$4 sm:$0xff]   ;;  %v1786_v4 = vld [vmem:[#allocation6 + $0x124] ss:$24 sps:$4 sm:$0xff]  }
  0x27   :  { %1269 = vmatprep.subr.bf16.mxu1 %v1782_v1  ;;  %1229 = vmatpush1.bf16.msra.mxu0 %v1784_v2  ;;  %v1788_v5 = vld [vmem:[#allocation6 + $0x424] ss:$24 sps:$4 sm:$0xff]   ;;  %v1790_v6 = vld [vmem:[#allocation6 + $0x120] ss:$24 sps:$4 sm:$0xff]   ;;  %v1792_v8 = vld [vmem:[#allocation6 + $0xf4] ss:$24 sps:$4 sm:$0xff]  }
  0x28   :  { %1270 = vmatpush1.bf16.msra.mxu1 %v1785_v3  ;;  %1230 = vmatprep.subr.bf16.mxu0 %v1786_v4  ;;  %v1791_v7 = vld [vmem:[#allocation6 + $0x420] ss:$24 sps:$4 sm:$0xff]   ;;  %v1794_v9 = vld [vmem:[#allocation6 + $0x3f4] ss:$24 sps:$4 sm:$0xff]   ;;  %v1796_v10 = vld [vmem:[#allocation6 + $0xf0] ss:$24 sps:$4 sm:$0xff]  }
  0x29   :  { %1271 = vmatprep.subr.bf16.mxu1 %v1788_v5  ;;  %v1797_v11 = vld [vmem:[#allocation6 + $0x3f0] ss:$24 sps:$4 sm:$0xff]   ;;  %v1798_v12 = vld [vmem:[#allocation6 + $0xc4] ss:$24 sps:$4 sm:$0xff]   ;;  %v1802_v14 = vld [vmem:[#allocation6 + $0xc0] ss:$24 sps:$4 sm:$0xff]  }
  0x2a   :  { %v1800_v13 = vld [vmem:[#allocation6 + $0x3c4] ss:$24 sps:$4 sm:$0xff]   ;;  %v1803_v15 = vld [vmem:[#allocation6 + $0x3c0] ss:$24 sps:$4 sm:$0xff]   ;;  %v1804_v16 = vld [vmem:[#allocation6 + $0x94] ss:$24 sps:$4 sm:$0xff]  }
  0x2b   :  { %1231 = vmatpush1.bf16.msra.mxu0 %v1790_v6  ;;  %v1806_v17 = vld [vmem:[#allocation6 + $0x394] ss:$24 sps:$4 sm:$0xff]   ;;  %v1808_v18 = vld [vmem:[#allocation6 + $0x90] ss:$24 sps:$4 sm:$0xff]   ;;  %v1810_v20 = vld [vmem:[#allocation6 + $0x64] ss:$24 sps:$4 sm:$0xff]  }
  0x2c   :  { %1272 = vmatpush1.bf16.msra.mxu1 %v1791_v7  ;;  %1232 = vmatprep.subr.bf16.mxu0 %v1792_v8  ;;  %v1809_v19 = vld [vmem:[#allocation6 + $0x390] ss:$24 sps:$4 sm:$0xff]   ;;  %v1812_v21 = vld [vmem:[#allocation6 + $0x364] ss:$24 sps:$4 sm:$0xff]   ;;  %v1814_v22 = vld [vmem:[#allocation6 + $0x60] ss:$24 sps:$4 sm:$0xff]  }
  0x2d   :  { %1273 = vmatprep.subr.bf16.mxu1 %v1794_v9  ;;  %v1815_v23 = vld [vmem:[#allocation6 + $0x360] ss:$24 sps:$4 sm:$0xff]   ;;  %v1816_v24 = vld [vmem:[#allocation6 + $0x34] ss:$24 sps:$4 sm:$0xff]   ;;  %v1820_v26 = vld [vmem:[#allocation6 + $0x30] ss:$24 sps:$4 sm:$0xff]  }
  0x2e   :  { %v1818_v25 = vld [vmem:[#allocation6 + $0x334] ss:$24 sps:$4 sm:$0xff]   ;;  %v1821_v27 = vld [vmem:[#allocation6 + $0x330] ss:$24 sps:$4 sm:$0xff]   ;;  %v1822_v28 = vld [vmem:[#allocation6 + $0x4] ss:$24 sps:$4 sm:$0xff]  }
  0x2f   :  { %1233 = vmatpush1.bf16.msra.mxu0 %v1796_v10  ;;  %v1824_v29 = vld [vmem:[#allocation6 + $0x304] ss:$24 sps:$4 sm:$0xff]   ;;  %v1826_v30 = vld [vmem:[#allocation6] ss:$24 sps:$4 sm:$0xff]   ;;  %v1828_v32 = vld [vmem:[#allocation6 + $0x2d4] ss:$24 sps:$4 sm:$0xff]  }
  0x30   :  { %1274 = vmatpush1.bf16.msra.mxu1 %v1797_v11  ;;  %1234 = vmatprep.subr.bf16.mxu0 %v1798_v12  ;;  %v1827_v31 = vld [vmem:[#allocation6 + $0x300] ss:$24 sps:$4 sm:$0xff]   ;;  %v1830_v33 = vld [vmem:[#allocation6 + $0x5d4] ss:$24 sps:$4 sm:$0xff]   ;;  %v1832_v34 = vld [vmem:[#allocation6 + $0x2d0] ss:$24 sps:$4 sm:$0xff]  }
  0x31   :  { %1275 = vmatprep.subr.bf16.mxu1 %v1800_v13  ;;  %v1833_v35 = vld [vmem:[#allocation6 + $0x5d0] ss:$24 sps:$4 sm:$0xff]   ;;  %v1834_v36 = vld [vmem:[#allocation6 + $0x2a4] ss:$24 sps:$4 sm:$0xff]   ;;  %v1838_v38 = vld [vmem:[#allocation6 + $0x2a0] ss:$24 sps:$4 sm:$0xff]  }
  0x32   :  { %v1836_v37 = vld [vmem:[#allocation6 + $0x5a4] ss:$24 sps:$4 sm:$0xff]   ;;  %v1839_v39 = vld [vmem:[#allocation6 + $0x5a0] ss:$24 sps:$4 sm:$0xff]   ;;  %v1840_v40 = vld [vmem:[#allocation6 + $0x274] ss:$24 sps:$4 sm:$0xff]  }
  0x33   :  { %1235 = vmatpush1.bf16.msra.mxu0 %v1802_v14  ;;  %v1842_v41 = vld [vmem:[#allocation6 + $0x574] ss:$24 sps:$4 sm:$0xff]   ;;  %v1844_v42 = vld [vmem:[#allocation6 + $0x270] ss:$24 sps:$4 sm:$0xff]   ;;  %v1846_v44 = vld [vmem:[#allocation6 + $0x244] ss:$24 sps:$4 sm:$0xff]  }
  0x34   :  { %1276 = vmatpush1.bf16.msra.mxu1 %v1803_v15  ;;  %1236 = vmatprep.subr.bf16.mxu0 %v1804_v16  ;;  %v1845_v43 = vld [vmem:[#allocation6 + $0x570] ss:$24 sps:$4 sm:$0xff]   ;;  %v1848_v45 = vld [vmem:[#allocation6 + $0x544] ss:$24 sps:$4 sm:$0xff]   ;;  %v1850_v47 = vld [vmem:[#allocation6 + $0x240] ss:$24 sps:$4 sm:$0xff]  }
  0x35   :  { %1277 = vmatprep.subr.bf16.mxu1 %v1806_v17  ;;  %v69_v46 = vld [vmem:[#allocation3 + $0x8] sm:$0xff]  ;;  %v1851_v48 = vld [vmem:[#allocation6 + $0x540] ss:$24 sps:$4 sm:$0xff]   ;;  %v1858_v56 = vld [vmem:[#allocation6 + $0x1e4] ss:$24 sps:$4 sm:$0xff]   ;;  %s2159_s0 = smov [#allocation9]  }
  0x36   :  { %v2189_v49 = vpack.c.bf16 %v69_v46, %v69_v46  ;;  %v71_v50 = vld [vmem:[#allocation3 + $0x18] sm:$0xff]  ;;  %v1852_v51 = vld [vmem:[#allocation6 + $0x214] ss:$24 sps:$4 sm:$0xff]   ;;  %v1856_v54 = vld [vmem:[#allocation6 + $0x210] ss:$24 sps:$4 sm:$0xff]   ;;  %s1566_s2 = sshll.u32 %s2159_s0, 4  ;;  %s1567_s2 = int_to_ptr.vmem [resolvable:$true] %s1566_s2 }
  0x37   :  { %1237 = vmatpush1.bf16.msra.mxu0 %v1808_v18  ;;  %v2191_v52 = vpack.c.bf16 %v71_v50, %v71_v50  ;;  %v1854_v53 = vld [vmem:[#allocation6 + $0x514] ss:$24 sps:$4 sm:$0xff]   ;;  %v1857_v55 = vld [vmem:[#allocation6 + $0x510] ss:$24 sps:$4 sm:$0xff]   ;;  %v1860_v57 = vld [vmem:[#allocation6 + $0x4e4] ss:$24 sps:$4 sm:$0xff]   ;;  %p2133_p2 = scmp.lt.s32.totalorder %s1567_s2, %s1567_s2 }
  0x38   :  { %1278 = vmatpush1.bf16.msra.mxu1 %v1809_v19  ;;  %1238 = vmatprep.subr.bf16.mxu0 %v1810_v20  ;;  %v1862_v58 = vld [vmem:[#allocation6 + $0x1e0] ss:$24 sps:$4 sm:$0xff]   ;;  %v1864_v60 = vld [vmem:[#allocation6 + $0x1b4] ss:$24 sps:$4 sm:$0xff]   ;;  %v1868_v62 = vld [vmem:[#allocation6 + $0x1b0] ss:$24 sps:$4 sm:$0xff]  }
  0x39   :  { %1279 = vmatprep.subr.bf16.mxu1 %v1812_v21  ;;  %1260 = vmatprep.mubr.bf16.mxu0 %v2189_v49  ;;  %v1863_v59 = vld [vmem:[#allocation6 + $0x4e0] ss:$24 sps:$4 sm:$0xff]   ;;  %v1866_v61 = vld [vmem:[#allocation6 + $0x4b4] ss:$24 sps:$4 sm:$0xff]   ;;  %v1869_v63 = vld [vmem:[#allocation6 + $0x4b0] ss:$24 sps:$4 sm:$0xff]  }
  0x3a   :  { %1301 = vmatprep.mubr.bf16.mxu1 %v2191_v52  ;;  %v1870_v0 = vld [vmem:[#allocation6 + $0x184] ss:$24 sps:$4 sm:$0xff]   ;;  %v1874_v2 = vld [vmem:[#allocation6 + $0x180] ss:$24 sps:$4 sm:$0xff]   ;;  %v70_v5 = vld [vmem:[#allocation3 + $0x10] sm:$0xff]  ;;  %s2128_s28 = scalar_lea.vmem %s1567_s2, 384 }
  0x3b   :  { %1239 = vmatpush1.bf16.msra.mxu0 %v1814_v22  ;;  %v1872_v1 = vld [vmem:[#allocation6 + $0x484] ss:$24 sps:$4 sm:$0xff]   ;;  %v1875_v3 = vld [vmem:[#allocation6 + $0x480] ss:$24 sps:$4 sm:$0xff]   ;;  %v2197_v9 = vpack.c.bf16 %v70_v5, %v70_v5  ;;  %p2129_p1 = scmp.ne.s32.totalorder %s1567_s2, %s2128_s28  ;;  %p2134_p3 = scmp.lt.s32.totalorder %s2128_s28, %s2128_s28 }
  0x3c   :  { %1280 = vmatpush1.bf16.msra.mxu1 %v1815_v23  ;;  %1240 = vmatprep.subr.bf16.mxu0 %v1816_v24  ;;  %v68_v4 = vld [vmem:[#allocation3] sm:$0xff]  ;;  %v1878_v6 = vld [vmem:[#allocation6 + $0x15c] ss:$24 sps:$4 sm:$0xff]   ;;  %v1876_v10 = vld [vmem:[#allocation6 + $0x158] ss:$24 sps:$4 sm:$0xff]  }
  0x3d   :  { %1281 = vmatprep.subr.bf16.mxu1 %v1818_v25  ;;  %v1881_v7 = vld [vmem:[#allocation6 + $0x45c] ss:$24 sps:$4 sm:$0xff]   ;;  %v2195_v8 = vpack.c.bf16 %v68_v4, %v68_v4  ;;  %v1879_v11 = vld [vmem:[#allocation6 + $0x458] ss:$24 sps:$4 sm:$0xff]   ;;  %v1884_v12 = vld [vmem:[#allocation6 + $0x12c] ss:$24 sps:$4 sm:$0xff]   ;;  %p2135_p4 = por %p2134_p3, %p2133_p2 }
  0x3e   :  { %v1887_v13 = vld [vmem:[#allocation6 + $0x42c] ss:$24 sps:$4 sm:$0xff]   ;;  %v1882_v14 = vld [vmem:[#allocation6 + $0x128] ss:$24 sps:$4 sm:$0xff]   ;;  %v1890_v16 = vld [vmem:[#allocation6 + $0xfc] ss:$24 sps:$4 sm:$0xff]  }
  0x3f   :  { %1241 = vmatpush1.bf16.msra.mxu0 %v1820_v26  ;;  %v1885_v15 = vld [vmem:[#allocation6 + $0x428] ss:$24 sps:$4 sm:$0xff]   ;;  %v1893_v17 = vld [vmem:[#allocation6 + $0x3fc] ss:$24 sps:$4 sm:$0xff]   ;;  %v1888_v18 = vld [vmem:[#allocation6 + $0xf8] ss:$24 sps:$4 sm:$0xff]   ;;  %p2136_p5 = pnand %p2135_p4, %p2129_p1 }
  0x40   :  { %1282 = vmatpush1.bf16.msra.mxu1 %v1821_v27  ;;  %1242 = vmatprep.subr.bf16.mxu0 %v1822_v28  ;;  %v1891_v19 = vld [vmem:[#allocation6 + $0x3f8] ss:$24 sps:$4 sm:$0xff]   ;;  %v1896_v20 = vld [vmem:[#allocation6 + $0xcc] ss:$24 sps:$4 sm:$0xff]   ;;  %v1894_v22 = vld [vmem:[#allocation6 + $0xc8] ss:$24 sps:$4 sm:$0xff]  }
  0x41   :  { %1283 = vmatprep.subr.bf16.mxu1 %v1824_v29  ;;  %v1899_v21 = vld [vmem:[#allocation6 + $0x3cc] ss:$24 sps:$4 sm:$0xff]   ;;  %v1897_v23 = vld [vmem:[#allocation6 + $0x3c8] ss:$24 sps:$4 sm:$0xff]   ;;  %v1902_v24 = vld [vmem:[#allocation6 + $0x9c] ss:$24 sps:$4 sm:$0xff]  }
  0x42   :  { %v1905_v25 = vld [vmem:[#allocation6 + $0x39c] ss:$24 sps:$4 sm:$0xff]   ;;  %v1900_v26 = vld [vmem:[#allocation6 + $0x98] ss:$24 sps:$4 sm:$0xff]   ;;  %v1908_v28 = vld [vmem:[#allocation6 + $0x6c] ss:$24 sps:$4 sm:$0xff]  }
  0x43   :  { %1243 = vmatpush1.bf16.msra.mxu0 %v1826_v30  ;;  %v1903_v27 = vld [vmem:[#allocation6 + $0x398] ss:$24 sps:$4 sm:$0xff]   ;;  %v1911_v29 = vld [vmem:[#allocation6 + $0x36c] ss:$24 sps:$4 sm:$0xff]   ;;  %v1906_v30 = vld [vmem:[#allocation6 + $0x68] ss:$24 sps:$4 sm:$0xff]  }
  0x44   :  { %1284 = vmatpush1.bf16.msra.mxu1 %v1827_v31  ;;  %1244 = vmatprep.subr.bf16.mxu0 %v1828_v32  ;;  %v1909_v31 = vld [vmem:[#allocation6 + $0x368] ss:$24 sps:$4 sm:$0xff]   ;;  %v1914_v32 = vld [vmem:[#allocation6 + $0x3c] ss:$24 sps:$4 sm:$0xff]   ;;  %v1960_v4 = vld [vmem:[#allocation6 + $0x1b8] ss:$24 sps:$4 sm:$0xff]  }
  0x45   :  { %1285 = vmatprep.subr.bf16.mxu1 %v1830_v33  ;;  %v1917_v33 = vld [vmem:[#allocation6 + $0x33c] ss:$24 sps:$4 sm:$0xff]   ;;  %v1930_v46 = vld [vmem:[#allocation6 + $0x2a8] ss:$24 sps:$4 sm:$0xff]   ;;  %v1963_v5 = vld [vmem:[#allocation6 + $0x4b8] ss:$24 sps:$4 sm:$0xff]  }
  0x46   :  { %v1941_v50 = vld [vmem:[#allocation6 + $0x57c] ss:$24 sps:$4 sm:$0xff]  }
  0x47   :  { %1245 = vmatpush2.bf16.msra.mxu0 %v1832_v34  ;;  %v1912_v34 = vld [vmem:[#allocation6 + $0x38] ss:$24 sps:$4 sm:$0xff]  }
  0x48   :  { %1286 = vmatpush2.bf16.msra.mxu1 %v1833_v35  ;;  %1246 = vmatprep.subr.bf16.mxu0 %v1834_v36  ;;  %v1915_v35 = vld [vmem:[#allocation6 + $0x338] ss:$24 sps:$4 sm:$0xff]   ;;  %v1920_v36 = vld [vmem:[#allocation6 + $0xc] ss:$24 sps:$4 sm:$0xff]  }
  0x49   :  { %1287 = vmatprep.subr.bf16.mxu1 %v1836_v37  ;;  %v1923_v37 = vld [vmem:[#allocation6 + $0x30c] ss:$24 sps:$4 sm:$0xff]  }
  0x4b   :  { %1247 = vmatpush2.bf16.msra.mxu0 %v1838_v38  ;;  %v1918_v38 = vld [vmem:[#allocation6 + $0x8] ss:$24 sps:$4 sm:$0xff]  }
  0x4c   :  { %1288 = vmatpush2.bf16.msra.mxu1 %v1839_v39  ;;  %1248 = vmatprep.subr.bf16.mxu0 %v1840_v40  ;;  %v1921_v39 = vld [vmem:[#allocation6 + $0x308] ss:$24 sps:$4 sm:$0xff]   ;;  %v1926_v40 = vld [vmem:[#allocation6 + $0x2dc] ss:$24 sps:$4 sm:$0xff]  }
  0x4d   :  { %1289 = vmatprep.subr.bf16.mxu1 %v1842_v41  ;;  %v1929_v41 = vld [vmem:[#allocation6 + $0x5dc] ss:$24 sps:$4 sm:$0xff]  }
  0x4f   :  { %1249 = vmatpush2.bf16.msra.mxu0 %v1844_v42  ;;  %v1924_v42 = vld [vmem:[#allocation6 + $0x2d8] ss:$24 sps:$4 sm:$0xff]  }
  0x50   :  { %1290 = vmatpush2.bf16.msra.mxu1 %v1845_v43  ;;  %1250 = vmatprep.subr.bf16.mxu0 %v1846_v44  ;;  %v1927_v43 = vld [vmem:[#allocation6 + $0x5d8] ss:$24 sps:$4 sm:$0xff]   ;;  %v1932_v44 = vld [vmem:[#allocation6 + $0x2ac] ss:$24 sps:$4 sm:$0xff]  }
  0x51   :  { %1291 = vmatprep.subr.bf16.mxu1 %v1848_v45  ;;  %v1935_v45 = vld [vmem:[#allocation6 + $0x5ac] ss:$24 sps:$4 sm:$0xff]  }
  0x53   :  { %1251 = vmatpush2.bf16.msra.mxu0 %v1850_v47  ;;  %v1933_v47 = vld [vmem:[#allocation6 + $0x5a8] ss:$24 sps:$4 sm:$0xff]  }
  0x54   :  { %1292 = vmatpush2.bf16.msra.mxu1 %v1851_v48  ;;  %1252 = vmatprep.subr.bf16.mxu0 %v1852_v51  ;;  %v1938_v48 = vld [vmem:[#allocation6 + $0x27c] ss:$24 sps:$4 sm:$0xff]   ;;  %v1936_v51 = vld [vmem:[#allocation6 + $0x278] ss:$24 sps:$4 sm:$0xff]  }
  0x55   :  { %1293 = vmatprep.subr.bf16.mxu1 %v1854_v53  ;;  %v1939_v53 = vld [vmem:[#allocation6 + $0x578] ss:$24 sps:$4 sm:$0xff]  }
  0x57   :  { %1253 = vmatpush2.bf16.msra.mxu0 %v1856_v54  ;;  %v1944_v54 = vld [vmem:[#allocation6 + $0x24c] ss:$24 sps:$4 sm:$0xff]  }
  0x58   :  { %1294 = vmatpush2.bf16.msra.mxu1 %v1857_v55  ;;  %1254 = vmatprep.subr.bf16.mxu0 %v1858_v56  ;;  %v1947_v55 = vld [vmem:[#allocation6 + $0x54c] ss:$24 sps:$4 sm:$0xff]   ;;  %v1942_v56 = vld [vmem:[#allocation6 + $0x248] ss:$24 sps:$4 sm:$0xff]  }
  0x59   :  { %1295 = vmatprep.subr.bf16.mxu1 %v1860_v57  ;;  %v1945_v57 = vld [vmem:[#allocation6 + $0x548] ss:$24 sps:$4 sm:$0xff]  }
  0x5b   :  { %1255 = vmatpush2.bf16.msra.mxu0 %v1862_v58  ;;  %v1950_v58 = vld [vmem:[#allocation6 + $0x21c] ss:$24 sps:$4 sm:$0xff]  }
  0x5c   :  { %1296 = vmatpush2.bf16.msra.mxu1 %v1863_v59  ;;  %1256 = vmatprep.subr.bf16.mxu0 %v1864_v60  ;;  %v1953_v59 = vld [vmem:[#allocation6 + $0x51c] ss:$24 sps:$4 sm:$0xff]   ;;  %v1948_v60 = vld [vmem:[#allocation6 + $0x218] ss:$24 sps:$4 sm:$0xff]  }
  0x5d   :  { %1297 = vmatprep.subr.bf16.mxu1 %v1866_v61  ;;  %v1951_v61 = vld [vmem:[#allocation6 + $0x518] ss:$24 sps:$4 sm:$0xff]  }
  0x5f   :  { %1257 = vmatpush2.bf16.msra.mxu0 %v1868_v62  ;;  %v1956_v62 = vld [vmem:[#allocation6 + $0x1ec] ss:$24 sps:$4 sm:$0xff]  }
  0x60   :  { %1298 = vmatpush2.bf16.msra.mxu1 %v1869_v63  ;;  %1258 = vmatprep.subr.bf16.mxu0 %v1870_v0  ;;  %v1959_v63 = vld [vmem:[#allocation6 + $0x4ec] ss:$24 sps:$4 sm:$0xff]   ;;  %v1954_v0 = vld [vmem:[#allocation6 + $0x1e8] ss:$24 sps:$4 sm:$0xff]  }
  0x61   :  { %1299 = vmatprep.subr.bf16.mxu1 %v1872_v1  ;;  %v1957_v1 = vld [vmem:[#allocation6 + $0x4e8] ss:$24 sps:$4 sm:$0xff]  }
  0x63   :  { %1259 = vmatpush2.bf16.msra.mxu0 %v1874_v2  ;;  %v1962_v2 = vld [vmem:[#allocation6 + $0x1bc] ss:$24 sps:$4 sm:$0xff]  }
  0x64   :  { %1300 = vmatpush2.bf16.msra.mxu1 %v1875_v3  ;;  %1310 = vmatprep.subr.bf16.mxu0 %v1878_v6  ;;  %v1965_v3 = vld [vmem:[#allocation6 + $0x4bc] ss:$24 sps:$4 sm:$0xff]   ;;  %v1968_v6 = vld [vmem:[#allocation6 + $0x18c] ss:$24 sps:$4 sm:$0xff]  }
  0x65   :  { %1351 = vmatprep.subr.bf16.mxu1 %v1881_v7  ;;  %v1971_v7 = vld [vmem:[#allocation6 + $0x48c] ss:$24 sps:$4 sm:$0xff]  }
  0x66   :  { %1261 = vmatmul.mubr.bf16.vlgmr.msra.gmra.mxu0 %v2195_v8 }
  0x67   :  { %1302 = vmatmul.mubr.bf16.vlgmr.msra.gmra.mxu1 %v2197_v9  ;;  %1311 = vmatpush1.bf16.msra.mxu0 %v1876_v10  ;;  %v1966_v10 = vld [vmem:[#allocation6 + $0x188] ss:$24 sps:$4 sm:$0xff]  }
  0x68   :  { %1352 = vmatpush1.bf16.msra.mxu1 %v1879_v11  ;;  %1312 = vmatprep.subr.bf16.mxu0 %v1884_v12  ;;  %v1969_v11 = vld [vmem:[#allocation6 + $0x488] ss:$24 sps:$4 sm:$0xff]   ;;  %v1974_v12 = vld [vmem:[#allocation6 + $0x164] ss:$24 sps:$4 sm:$0xff]  }
  0x69   :  { %1353 = vmatprep.subr.bf16.mxu1 %v1887_v13  ;;  %1342 = vmatprep.mubr.bf16.mxu0 %v2189_v49  ;;  %v1977_v13 = vld [vmem:[#allocation6 + $0x464] ss:$24 sps:$4 sm:$0xff]  }
  0x6a   :  { %1383 = vmatprep.mubr.bf16.mxu1 %v2191_v52 }
  0x6b   :  { %1313 = vmatpush1.bf16.msra.mxu0 %v1882_v14  ;;  %v1972_v14 = vld [vmem:[#allocation6 + $0x160] ss:$24 sps:$4 sm:$0xff]  }
  0x6c   :  { %1354 = vmatpush1.bf16.msra.mxu1 %v1885_v15  ;;  %1314 = vmatprep.subr.bf16.mxu0 %v1890_v16  ;;  %v1975_v15 = vld [vmem:[#allocation6 + $0x460] ss:$24 sps:$4 sm:$0xff]   ;;  %v1980_v16 = vld [vmem:[#allocation6 + $0x134] ss:$24 sps:$4 sm:$0xff]  }
  0x6d   :  { %1355 = vmatprep.subr.bf16.mxu1 %v1893_v17  ;;  %v1983_v17 = vld [vmem:[#allocation6 + $0x434] ss:$24 sps:$4 sm:$0xff]  }
  0x6f   :  { %1315 = vmatpush1.bf16.msra.mxu0 %v1888_v18  ;;  %v1978_v18 = vld [vmem:[#allocation6 + $0x130] ss:$24 sps:$4 sm:$0xff]  }
  0x70   :  { %1356 = vmatpush1.bf16.msra.mxu1 %v1891_v19  ;;  %1316 = vmatprep.subr.bf16.mxu0 %v1896_v20  ;;  %v1981_v19 = vld [vmem:[#allocation6 + $0x430] ss:$24 sps:$4 sm:$0xff]   ;;  %v1986_v20 = vld [vmem:[#allocation6 + $0x104] ss:$24 sps:$4 sm:$0xff]  }
  0x71   :  { %1357 = vmatprep.subr.bf16.mxu1 %v1899_v21  ;;  %v1989_v21 = vld [vmem:[#allocation6 + $0x404] ss:$24 sps:$4 sm:$0xff]  }
  0x73   :  { %1317 = vmatpush1.bf16.msra.mxu0 %v1894_v22  ;;  %v1984_v22 = vld [vmem:[#allocation6 + $0x100] ss:$24 sps:$4 sm:$0xff]  }
  0x74   :  { %1358 = vmatpush1.bf16.msra.mxu1 %v1897_v23  ;;  %1318 = vmatprep.subr.bf16.mxu0 %v1902_v24  ;;  %v1987_v23 = vld [vmem:[#allocation6 + $0x400] ss:$24 sps:$4 sm:$0xff]   ;;  %v1992_v24 = vld [vmem:[#allocation6 + $0xd4] ss:$24 sps:$4 sm:$0xff]  }
  0x75   :  { %1359 = vmatprep.subr.bf16.mxu1 %v1905_v25  ;;  %v1995_v25 = vld [vmem:[#allocation6 + $0x3d4] ss:$24 sps:$4 sm:$0xff]  }
  0x77   :  { %1319 = vmatpush1.bf16.msra.mxu0 %v1900_v26  ;;  %v1990_v26 = vld [vmem:[#allocation6 + $0xd0] ss:$24 sps:$4 sm:$0xff]  }
  0x78   :  { %1360 = vmatpush1.bf16.msra.mxu1 %v1903_v27  ;;  %1320 = vmatprep.subr.bf16.mxu0 %v1908_v28  ;;  %v1993_v27 = vld [vmem:[#allocation6 + $0x3d0] ss:$24 sps:$4 sm:$0xff]   ;;  %v1998_v28 = vld [vmem:[#allocation6 + $0xa4] ss:$24 sps:$4 sm:$0xff]  }
  0x79   :  { %1361 = vmatprep.subr.bf16.mxu1 %v1911_v29  ;;  %v2001_v29 = vld [vmem:[#allocation6 + $0x3a4] ss:$24 sps:$4 sm:$0xff]  }
  0x7b   :  { %1321 = vmatpush1.bf16.msra.mxu0 %v1906_v30  ;;  %v2004_v30 = vld [vmem:[#allocation6 + $0x74] ss:$24 sps:$4 sm:$0xff]  }
  0x7c   :  { %1362 = vmatpush1.bf16.msra.mxu1 %v1909_v31  ;;  %1322 = vmatprep.subr.bf16.mxu0 %v1914_v32  ;;  %v2007_v31 = vld [vmem:[#allocation6 + $0x374] ss:$24 sps:$4 sm:$0xff]   ;;  %v2002_v32 = vld [vmem:[#allocation6 + $0x70] ss:$24 sps:$4 sm:$0xff]  }
  0x7d   :  { %1363 = vmatprep.subr.bf16.mxu1 %v1917_v33  ;;  %v2005_v33 = vld [vmem:[#allocation6 + $0x370] ss:$24 sps:$4 sm:$0xff]  }
  0x7f   :  { %1323 = vmatpush1.bf16.msra.mxu0 %v1912_v34  ;;  %v2010_v34 = vld [vmem:[#allocation6 + $0x44] ss:$24 sps:$4 sm:$0xff]  }
  0x80   :  { %1364 = vmatpush1.bf16.msra.mxu1 %v1915_v35  ;;  %1324 = vmatprep.subr.bf16.mxu0 %v1920_v36  ;;  %v2013_v35 = vld [vmem:[#allocation6 + $0x344] ss:$24 sps:$4 sm:$0xff]   ;;  %v2008_v36 = vld [vmem:[#allocation6 + $0x40] ss:$24 sps:$4 sm:$0xff]  }
  0x81   :  { %1365 = vmatprep.subr.bf16.mxu1 %v1923_v37  ;;  %v2011_v37 = vld [vmem:[#allocation6 + $0x340] ss:$24 sps:$4 sm:$0xff]  }
  0x83   :  { %1325 = vmatpush1.bf16.msra.mxu0 %v1918_v38  ;;  %v2016_v38 = vld [vmem:[#allocation6 + $0x14] ss:$24 sps:$4 sm:$0xff]  }
  0x84   :  { %1366 = vmatpush1.bf16.msra.mxu1 %v1921_v39  ;;  %1326 = vmatprep.subr.bf16.mxu0 %v1926_v40  ;;  %v2019_v39 = vld [vmem:[#allocation6 + $0x314] ss:$24 sps:$4 sm:$0xff]   ;;  %v2014_v40 = vld [vmem:[#allocation6 + $0x10] ss:$24 sps:$4 sm:$0xff]  }
  0x85   :  { %1367 = vmatprep.subr.bf16.mxu1 %v1929_v41  ;;  %v2017_v41 = vld [vmem:[#allocation6 + $0x310] ss:$24 sps:$4 sm:$0xff]  }
  0x87   :  { %1327 = vmatpush2.bf16.msra.mxu0 %v1924_v42  ;;  %v2022_v42 = vld [vmem:[#allocation6 + $0x2e4] ss:$24 sps:$4 sm:$0xff]  }
  0x88   :  { %1368 = vmatpush2.bf16.msra.mxu1 %v1927_v43  ;;  %1328 = vmatprep.subr.bf16.mxu0 %v1932_v44  ;;  %v2025_v43 = vld [vmem:[#allocation6 + $0x5e4] ss:$24 sps:$4 sm:$0xff]   ;;  %v2020_v44 = vld [vmem:[#allocation6 + $0x2e0] ss:$24 sps:$4 sm:$0xff]  }
  0x89   :  { %1369 = vmatprep.subr.bf16.mxu1 %v1935_v45  ;;  %v2023_v45 = vld [vmem:[#allocation6 + $0x5e0] ss:$24 sps:$4 sm:$0xff]  }
  0x8b   :  { %1329 = vmatpush2.bf16.msra.mxu0 %v1930_v46  ;;  %v2028_v46 = vld [vmem:[#allocation6 + $0x2b4] ss:$24 sps:$4 sm:$0xff]  }
  0x8c   :  { %1370 = vmatpush2.bf16.msra.mxu1 %v1933_v47  ;;  %1330 = vmatprep.subr.bf16.mxu0 %v1938_v48  ;;  %v2031_v47 = vld [vmem:[#allocation6 + $0x5b4] ss:$24 sps:$4 sm:$0xff]   ;;  %v2026_v48 = vld [vmem:[#allocation6 + $0x2b0] ss:$24 sps:$4 sm:$0xff]  }
  0x8d   :  { %1371 = vmatprep.subr.bf16.mxu1 %v1941_v50  ;;  %v2029_v50 = vld [vmem:[#allocation6 + $0x5b0] ss:$24 sps:$4 sm:$0xff]  }
  0x8f   :  { %1331 = vmatpush2.bf16.msra.mxu0 %v1936_v51  ;;  %v2034_v51 = vld [vmem:[#allocation6 + $0x284] ss:$24 sps:$4 sm:$0xff]  }
  0x90   :  { %1372 = vmatpush2.bf16.msra.mxu1 %v1939_v53  ;;  %1332 = vmatprep.subr.bf16.mxu0 %v1944_v54  ;;  %v2037_v53 = vld [vmem:[#allocation6 + $0x584] ss:$24 sps:$4 sm:$0xff]   ;;  %v2032_v54 = vld [vmem:[#allocation6 + $0x280] ss:$24 sps:$4 sm:$0xff]  }
  0x91   :  { %1373 = vmatprep.subr.bf16.mxu1 %v1947_v55  ;;  %v2035_v55 = vld [vmem:[#allocation6 + $0x580] ss:$24 sps:$4 sm:$0xff]  }
  0x93   :  { %1333 = vmatpush2.bf16.msra.mxu0 %v1942_v56  ;;  %v2040_v56 = vld [vmem:[#allocation6 + $0x254] ss:$24 sps:$4 sm:$0xff]  }
  0x94   :  { %1374 = vmatpush2.bf16.msra.mxu1 %v1945_v57  ;;  %1334 = vmatprep.subr.bf16.mxu0 %v1950_v58  ;;  %v2043_v57 = vld [vmem:[#allocation6 + $0x554] ss:$24 sps:$4 sm:$0xff]   ;;  %v2038_v58 = vld [vmem:[#allocation6 + $0x250] ss:$24 sps:$4 sm:$0xff]  }
  0x95   :  { %1375 = vmatprep.subr.bf16.mxu1 %v1953_v59  ;;  %v2041_v59 = vld [vmem:[#allocation6 + $0x550] ss:$24 sps:$4 sm:$0xff]  }
  0x97   :  { %1335 = vmatpush2.bf16.msra.mxu0 %v1948_v60  ;;  %v2046_v60 = vld [vmem:[#allocation6 + $0x224] ss:$24 sps:$4 sm:$0xff]  }
  0x98   :  { %1376 = vmatpush2.bf16.msra.mxu1 %v1951_v61  ;;  %1336 = vmatprep.subr.bf16.mxu0 %v1956_v62  ;;  %v2049_v61 = vld [vmem:[#allocation6 + $0x524] ss:$24 sps:$4 sm:$0xff]   ;;  %v2044_v62 = vld [vmem:[#allocation6 + $0x220] ss:$24 sps:$4 sm:$0xff]  }
  0x99   :  { %1377 = vmatprep.subr.bf16.mxu1 %v1959_v63  ;;  %v2047_v63 = vld [vmem:[#allocation6 + $0x520] ss:$24 sps:$4 sm:$0xff]  }
  0x9b   :  { %1337 = vmatpush2.bf16.msra.mxu0 %v1954_v0  ;;  %v2052_v0 = vld [vmem:[#allocation6 + $0x1f4] ss:$24 sps:$4 sm:$0xff]  }
  0x9c   :  { %1378 = vmatpush2.bf16.msra.mxu1 %v1957_v1  ;;  %1338 = vmatprep.subr.bf16.mxu0 %v1962_v2  ;;  %v2055_v1 = vld [vmem:[#allocation6 + $0x4f4] ss:$24 sps:$4 sm:$0xff]   ;;  %v2050_v2 = vld [vmem:[#allocation6 + $0x1f0] ss:$24 sps:$4 sm:$0xff]  }
  0x9d   :  { %1379 = vmatprep.subr.bf16.mxu1 %v1965_v3  ;;  %v2053_v3 = vld [vmem:[#allocation6 + $0x4f0] ss:$24 sps:$4 sm:$0xff]  }
  0x9f   :  { %1339 = vmatpush2.bf16.msra.mxu0 %v1960_v4  ;;  %v2058_v4 = vld [vmem:[#allocation6 + $0x1c4] ss:$24 sps:$4 sm:$0xff]  }
  0xa0   :  { %1380 = vmatpush2.bf16.msra.mxu1 %v1963_v5  ;;  %1340 = vmatprep.subr.bf16.mxu0 %v1968_v6  ;;  %v2061_v5 = vld [vmem:[#allocation6 + $0x4c4] ss:$24 sps:$4 sm:$0xff]   ;;  %v2056_v6 = vld [vmem:[#allocation6 + $0x1c0] ss:$24 sps:$4 sm:$0xff]  }
  0xa1   :  { %1381 = vmatprep.subr.bf16.mxu1 %v1971_v7  ;;  %v2059_v7 = vld [vmem:[#allocation6 + $0x4c0] ss:$24 sps:$4 sm:$0xff]  }
  0xa3   :  { %1341 = vmatpush2.bf16.msra.mxu0 %v1966_v10  ;;  %v2064_v10 = vld [vmem:[#allocation6 + $0x194] ss:$24 sps:$4 sm:$0xff]  }
  0xa4   :  { %1382 = vmatpush2.bf16.msra.mxu1 %v1969_v11  ;;  %1392 = vmatprep.subr.bf16.mxu0 %v1974_v12  ;;  %v2067_v11 = vld [vmem:[#allocation6 + $0x494] ss:$24 sps:$4 sm:$0xff]   ;;  %v2062_v12 = vld [vmem:[#allocation6 + $0x190] ss:$24 sps:$4 sm:$0xff]  }
  0xa5   :  { %1433 = vmatprep.subr.bf16.mxu1 %v1977_v13  ;;  %v2065_v13 = vld [vmem:[#allocation6 + $0x490] ss:$24 sps:$4 sm:$0xff]  }
  0xa6   :  { %1343 = vmatmul.mubr.bf16.vlgmr.msra.gmra.mxu0 %v2195_v8 }
  0xa7   :  { %1384 = vmatmul.mubr.bf16.vlgmr.msra.gmra.mxu1 %v2197_v9  ;;  %1393 = vmatpush1.bf16.msra.mxu0 %v1972_v14  ;;  %v1497_v14 = vlaneseq }
  0xa8   :  { %1434 = vmatpush1.bf16.msra.mxu1 %v1975_v15  ;;  %1394 = vmatprep.subr.bf16.mxu0 %v1980_v16 }
  0xa9   :  { %1435 = vmatprep.subr.bf16.mxu1 %v1983_v17  ;;  %1424 = vmatprep.mubr.bf16.mxu0 %v2189_v49  ;;  %v1996_v49 = vld [vmem:[#allocation6 + $0xa0] ss:$24 sps:$4 sm:$0xff]   ;;  %v1498_v15 = vshrl.u32 %v1497_v14, 7 }
  0xaa   :  { %1465 = vmatprep.mubr.bf16.mxu1 %v2191_v52  ;;  %v1999_v52 = vld [vmem:[#allocation6 + $0x3a0] ss:$24 sps:$4 sm:$0xff]  }
  0xab   :  { %1395 = vmatpush1.bf16.msra.mxu0 %v1978_v18  ;;  %v1499_v16 = vsub.s32 0, %v1498_v15  ;;  %v1495_v17 = vld [vmem:[#allocation8] sm:$0x3f]  ;;  %v1503_v18 = vsub.s32 1, %v1498_v15 }
  0xac   :  { %1436 = vmatpush1.bf16.msra.mxu1 %v1981_v19  ;;  %1396 = vmatprep.subr.bf16.mxu0 %v1986_v20 }
  0xad   :  { %1437 = vmatprep.subr.bf16.mxu1 %v1989_v21  ;;  %v1500_v19 = vrot.slane %v1495_v17, %v1499_v16 }
  0xaf   :  { %1397 = vmatpush1.bf16.msra.mxu0 %v1984_v22 }
  0xb0   :  { %1438 = vmatpush1.bf16.msra.mxu1 %v1987_v23  ;;  %1398 = vmatprep.subr.bf16.mxu0 %v1992_v24  ;;  %v1504_v23 = vrot.slane %v1495_v17, %v1503_v18 }
  0xb1   :  { %1439 = vmatprep.subr.bf16.mxu1 %v1995_v25 }
  0xb3   :  { %1399 = vmatpush1.bf16.msra.mxu0 %v1990_v26 }
  0xb4   :  { %1440 = vmatpush1.bf16.msra.mxu1 %v1993_v27  ;;  %1400 = vmatprep.subr.bf16.mxu0 %v1998_v28 }
  0xb5   :  { %1441 = vmatprep.subr.bf16.mxu1 %v2001_v29 }
  0xb7   :  { %1401 = vmatpush1.bf16.msra.mxu0 %v1996_v49 }
  0xb8   :  { %1442 = vmatpush1.bf16.msra.mxu1 %v1999_v52  ;;  %1402 = vmatprep.subr.bf16.mxu0 %v2004_v30  ;;  %v1507_v30 = vsub.s32 2, %v1498_v15 }
  0xb9   :  { %1443 = vmatprep.subr.bf16.mxu1 %v2007_v31  ;;  %v1511_v31 = vsub.s32 3, %v1498_v15 }
  0xbb   :  { %1403 = vmatpush1.bf16.msra.mxu0 %v2002_v32  ;;  %v1508_v32 = vrot.slane %v1495_v17, %v1507_v30 }
  0xbc   :  { %1444 = vmatpush1.bf16.msra.mxu1 %v2005_v33  ;;  %1404 = vmatprep.subr.bf16.mxu0 %v2010_v34 }
  0xbd   :  { %1445 = vmatprep.subr.bf16.mxu1 %v2013_v35 }
  0xbf   :  { %1405 = vmatpush1.bf16.msra.mxu0 %v2008_v36  ;;  %v1512_v36 = vrot.slane %v1495_v17, %v1511_v31 }
  0xc0   :  { %1446 = vmatpush1.bf16.msra.mxu1 %v2011_v37  ;;  %1406 = vmatprep.subr.bf16.mxu0 %v2016_v38 }
  0xc1   :  { %1447 = vmatprep.subr.bf16.mxu1 %v2019_v39 }
  0xc3   :  { %1407 = vmatpush1.bf16.msra.mxu0 %v2014_v40 }
  0xc4   :  { %1448 = vmatpush1.bf16.msra.mxu1 %v2017_v41  ;;  %1408 = vmatprep.subr.bf16.mxu0 %v2022_v42 }
  0xc5   :  { %1449 = vmatprep.subr.bf16.mxu1 %v2025_v43 }
  0xc7   :  { %1409 = vmatpush2.bf16.msra.mxu0 %v2020_v44 }
  0xc8   :  { %1450 = vmatpush2.bf16.msra.mxu1 %v2023_v45  ;;  %1410 = vmatprep.subr.bf16.mxu0 %v2028_v46 }
  0xc9   :  { %1451 = vmatprep.subr.bf16.mxu1 %v2031_v47  ;;  %v1515_v47 = vsub.s32 4, %v1498_v15 }
  0xcb   :  { %1411 = vmatpush2.bf16.msra.mxu0 %v2026_v48  ;;  %v1519_v48 = vsub.s32 5, %v1498_v15 }
  0xcc   :  { %1452 = vmatpush2.bf16.msra.mxu1 %v2029_v50  ;;  %1412 = vmatprep.subr.bf16.mxu0 %v2034_v51 }
  0xcd   :  { %1453 = vmatprep.subr.bf16.mxu1 %v2037_v53 }
  0xcf   :  { %1413 = vmatpush2.bf16.msra.mxu0 %v2032_v54  ;;  %v1516_v54 = vrot.slane %v1495_v17, %v1515_v47 }
  0xd0   :  { %1454 = vmatpush2.bf16.msra.mxu1 %v2035_v55  ;;  %1414 = vmatprep.subr.bf16.mxu0 %v2040_v56  ;;  %v1520_v55 = vrot.slane %v1495_v17, %v1519_v48 }
  0xd1   :  { %1455 = vmatprep.subr.bf16.mxu1 %v2043_v57 }
  0xd3   :  { %1415 = vmatpush2.bf16.msra.mxu0 %v2038_v58 }
  0xd4   :  { %1456 = vmatpush2.bf16.msra.mxu1 %v2041_v59  ;;  %1416 = vmatprep.subr.bf16.mxu0 %v2046_v60 }
  0xd5   :  { %1457 = vmatprep.subr.bf16.mxu1 %v2049_v61 }
  0xd7   :  { %1417 = vmatpush2.bf16.msra.mxu0 %v2044_v62 }
  0xd8   :  { %1458 = vmatpush2.bf16.msra.mxu1 %v2047_v63  ;;  %1418 = vmatprep.subr.bf16.mxu0 %v2052_v0 }
  0xd9   :  { %1459 = vmatprep.subr.bf16.mxu1 %v2055_v1 }
  0xdb   :  { %1419 = vmatpush2.bf16.msra.mxu0 %v2050_v2 }
  0xdc   :  { %1460 = vmatpush2.bf16.msra.mxu1 %v2053_v3  ;;  %1420 = vmatprep.subr.bf16.mxu0 %v2058_v4 }
  0xdd   :  { %1461 = vmatprep.subr.bf16.mxu1 %v2061_v5 }
  0xdf   :  { %1421 = vmatpush2.bf16.msra.mxu0 %v2056_v6 }
  0xe0   :  { %1462 = vmatpush2.bf16.msra.mxu1 %v2059_v7  ;;  %1422 = vmatprep.subr.bf16.mxu0 %v2064_v10 }
  0xe1   :  { %1463 = vmatprep.subr.bf16.mxu1 %v2067_v11 }
  0xe3   :  { %1423 = vmatpush2.bf16.msra.mxu0 %v2062_v12 }
  0xe4   :  { %1464 = vmatpush2.bf16.msra.mxu1 %v2065_v13 }
  0xe6   :  { %1425 = vmatmul.mubr.bf16.vlgmr.msra.gmra.mxu0 %v2195_v8 }
  0xe7   :  { %1466 = vmatmul.mubr.bf16.vlgmr.msra.gmra.mxu1 %v2197_v9 }
 0x126   :  { %v1262_v20 = vpop.f32.mrf.mxu0 }
 0x127   :  { %v1303_v21 = vpop.f32.mrf.mxu1 }
 0x128   :  { %v1304_v22 = vadd.f32 %v1303_v21, %v1262_v20  ;;  %v1264_v24 = vpop.f32.mrf.mxu0 }
 0x129   :  { %v1305_v25 = vpop.f32.mrf.mxu1 }
 0x12a   :  { %v1527_v26 = vadd.f32 %v1500_v19, %v1304_v22  ;;  %v1306_v27 = vadd.f32 %v1305_v25, %v1264_v24  ;;  %v1266_v28 = vpop.f32.mrf.mxu0 }
 0x12b   :  { %v1307_v29 = vpop.f32.mrf.mxu1 }
 0x12c   :  { %v1528_v49 = vadd.f32 %v1504_v23, %v1306_v27  ;;  %v1267_v8 = vpop.f32.mrf.mxu0 }
 0x12d   :  { %v1308_v52 = vpop.f32.mrf.mxu1 }
 0x12e   :  { %v1771_v9 = vpack.c.bf16 %v1528_v49, %v1527_v26 }
 0x130   :  { %1557 = vst [vmem:[#allocation9] sm:$0xff] %v1771_v9 }
 0x166   :  { %v1344_v33 = vpop.f32.mrf.mxu0 }
 0x167   :  { %v1385_v34 = vpop.f32.mrf.mxu1 }
 0x168   :  { %v1386_v35 = vadd.f32 %v1385_v34, %v1344_v33  ;;  %v1346_v37 = vpop.f32.mrf.mxu0 }
 0x169   :  { %v1387_v38 = vpop.f32.mrf.mxu1 }
 0x16a   :  { %v1529_v39 = vadd.f32 %v1508_v32, %v1386_v35  ;;  %v1388_v40 = vadd.f32 %v1387_v38, %v1346_v37  ;;  %v1348_v41 = vpop.f32.mrf.mxu0 }
 0x16b   :  { %v1389_v42 = vpop.f32.mrf.mxu1 }
 0x16c   :  { %v1530_v43 = vadd.f32 %v1512_v36, %v1388_v40  ;;  %v1349_v44 = vpop.f32.mrf.mxu0 }
 0x16d   :  { %v1390_v45 = vpop.f32.mrf.mxu1 }
 0x16e   :  { %v1772_v46 = vpack.c.bf16 %v1530_v43, %v1529_v39 }
 0x170   :  { %1558 = vst [vmem:[#allocation9 + $0x8] sm:$0xff] %v1772_v46 }
 0x1a6   :  { %v1426_v50 = vpop.f32.mrf.mxu0 }
 0x1a7   :  { %v1467_v51 = vpop.f32.mrf.mxu1 }
 0x1a8   :  { %v1468_v53 = vadd.f32 %v1467_v51, %v1426_v50  ;;  %v1428_v56 = vpop.f32.mrf.mxu0 }
 0x1a9   :  { %v1469_v57 = vpop.f32.mrf.mxu1 }
 0x1aa   :  { %v1470_v58 = vadd.f32 %v1469_v57, %v1428_v56  ;;  %v1430_v59 = vpop.f32.mrf.mxu0  ;;  %v1531_v61 = vadd.f32 %v1516_v54, %v1468_v53 }
 0x1ab   :  { %v1471_v60 = vpop.f32.mrf.mxu1 }
 0x1ac   :  { %v1532_v62 = vadd.f32 %v1520_v55, %v1470_v58  ;;  %v1431_v63 = vpop.f32.mrf.mxu0 }
 0x1ad   :  { %v1472_v0 = vpop.f32.mrf.mxu1 }
 0x1ae   :  { %v1773_v1 = vpack.c.bf16 %v1532_v62, %v1531_v61 }
 0x1b0   :  { %1559 = vst [vmem:[#allocation9 + $0x10] sm:$0xff] %v1773_v1 }
 0x1b1   :  { %2139 = shalt.err (!%p2136_p5)
}
 0x1b2   :  { %1569 = dma.vmem_to_hbm [thread:$0]  %s1567_s2, 384, %s2215_s3, [#allocation5]  }
 0x1b3   :  { %2152 = dma.done.wait [#allocation5], 384  }
 0x1b4   :  { %2153 = vsyncadd [#allocation5], 4294966912 }
 0x1b5   :  { %1573 = vsyncpa [#allocation4], 1 }
 0x1b6   :  { %1574 = vsyncpa [#allocation7], 1 }
 0x1b7   :  { %1575 = vsyncpa [#allocation5], 1 }

</bundles_post_ra>
